<compile_context>
chip_gen: v6e
topology: v6e:2x2x1
jax: 0.10.0
libtpu: 0.0.40
codegen_flags: <defaults>
</compile_context>

<pallas_src>
import functools

import numpy as np
import jax
import jax.numpy as jnp
from jax.experimental import pallas as pl
from jax.experimental.pallas import tpu as pltpu


def _dino_loss_kernel(scalars_ref, student_ref, teacher_ref, center_ref,
                      loss_ref, tsum_ref, *, tile_b, batch, needs_mask):
    """One (tile_b, D) tile: partial cross-entropy loss + partial teacher col-sum."""
    inv_student_temp = scalars_ref[0]
    inv_teacher_temp = scalars_ref[1]

    stud = student_ref[...].astype(jnp.float32)        # (tile_b, D)
    teach = teacher_ref[...].astype(jnp.float32)       # (tile_b, D)

    if needs_mask:  # static: only emitted when the last tile is partial
        row = (pl.program_id(0) * tile_b
               + jax.lax.broadcasted_iota(jnp.int32, (tile_b, 1), 0))
        valid = row < batch
        stud = jnp.where(valid, stud, 0.0)
        teach = jnp.where(valid, teach, 0.0)

    # Partial batch-center: column sum of the already-loaded teacher tile.
    tsum_ref[...] = jnp.sum(teach, axis=0, keepdims=True)            # (1, D)

    s = stud * inv_student_temp
    t = (teach - center_ref[...]) * inv_teacher_temp

    # Student: stable log-sum-exp (log-softmax never materialized as (B, D)).
    s_max = jnp.max(s, axis=-1, keepdims=True)
    s_shift = s - s_max
    s_lse = jnp.log(jnp.sum(jnp.exp(s_shift), axis=-1, keepdims=True))

    # Teacher: un-normalized softmax numerator.
    t_max = jnp.max(t, axis=-1, keepdims=True)
    t_exp = jnp.exp(t - t_max)
    t_denom = jnp.sum(t_exp, axis=-1, keepdims=True)                  # (tile_b, 1)
    row_dot = jnp.sum(t_exp * s_shift, axis=-1, keepdims=True)        # (tile_b, 1)

    # sum(-softmax(t) * log_softmax(s), -1) == (t_denom*s_lse - row_dot) / t_denom
    inv_denom = pl.reciprocal(t_denom, approx=True)                   # EUP slot
    inv_denom = inv_denom * (2.0 - t_denom * inv_denom)               # one NR step, per-row
    loss_rows = (t_denom * s_lse - row_dot) * inv_denom               # (tile_b, 1)
    if needs_mask:
        loss_rows = jnp.where(valid, loss_rows, 0.0)

    # Lane-dense (1, 128) store of the tile's partial loss (avoids masked vst).
    loss_ref[...] = jnp.full((1, 128), jnp.sum(loss_rows), dtype=jnp.float32)


def _choose_tile_b(batch, out_dim, itemsize, target_block_bytes=4 << 20):
    """Pick a batch tile so one input block stays ~<=4 MiB and sublane-aligned."""
    row_bytes = max(out_dim * itemsize, 1)
    tb = int(min(target_block_bytes // row_bytes, 512, batch))
    if tb >= batch:
        return batch                       # whole batch in one block
    # TODO(synk): if out_dim is so large that even 8 rows blow VMEM, tile D with an
    # online-logsumexp accumulator instead of shrinking TILE_B below 8 sublanes.
    return max(8, (tb // 8) * 8)


@functools.partial(jax.jit, static_argnames=("tile_b",))
def _dino_forward(student, teacher, center, scalars, *, tile_b):
    """scalars = f32[3]: [1/student_temp, 1/teacher_temp, center_momentum]."""
    B, D = student.shape
    num_tiles = pl.cdiv(B, tile_b)
    needs_mask = (B % tile_b) != 0

    kernel = functools.partial(_dino_loss_kernel, tile_b=tile_b, batch=B,
                               needs_mask=needs_mask)

    part_loss, part_tsum = pl.pallas_call(
        kernel,
        grid=(num_tiles,),
        in_specs=[
            pl.BlockSpec(memory_space=pltpu.MemorySpace.SMEM),        # scalars
            pl.BlockSpec((tile_b, D), lambda i: (i, 0)),              # student tile
            pl.BlockSpec((tile_b, D), lambda i: (i, 0)),              # teacher tile
            pl.BlockSpec((1, D), lambda i: (0, 0)),                   # center (resident)
        ],
        out_specs=(
            pl.BlockSpec((1, 128), lambda i: (i, 0)),                 # partial loss
            pl.BlockSpec((1, D), lambda i: (i, 0)),                   # partial teacher sum
        ),
        out_shape=(
            jax.ShapeDtypeStruct((num_tiles, 128), jnp.float32),
            jax.ShapeDtypeStruct((num_tiles, D), jnp.float32),
        ),
        compiler_params=pltpu.CompilerParams(
            dimension_semantics=("parallel",),
            vmem_limit_bytes=32 * 1024 * 1024,
        ),
    )(scalars, student, teacher, center)

    inv_b = 1.0 / B
    loss = jnp.sum(part_loss[:, 0]) * inv_b
    batch_center = jnp.sum(part_tsum, axis=0, keepdims=True) * inv_b
    # TODO(synk): the PyTorch module does dist.all_reduce(batch_center); world_size==1
    # assumed here — multi-device training needs jax.lax.pmean over the data axis.
    momentum = scalars[2]
    new_center = center * momentum + batch_center * (1.0 - momentum)
    return loss, new_center


class DINOLossPallas:
    """JAX/Pallas port of the PyTorch DINOLoss module (forward semantics)."""

    def __init__(self, out_dim, ncrops, warmup_teacher_temp, teacher_temp,
                 warmup_teacher_temp_epochs, nepochs,
                 student_temp=0.1, center_momentum=0.9):
        self.student_temp = float(student_temp)
        self.center_momentum = float(center_momentum)
        self.ncrops = ncrops  # kept for parity; the reference forward() does not chunk crops
        self.out_dim = out_dim
        self.center = jnp.zeros((1, out_dim), dtype=jnp.float32)
        self.teacher_temp_schedule = np.concatenate((
            np.linspace(warmup_teacher_temp, teacher_temp,
                        warmup_teacher_temp_epochs),
            np.ones(nepochs - warmup_teacher_temp_epochs) * teacher_temp,
        ))

    def forward(self, student_output, teacher_output, epoch, tile_b=None):
        # TODO(synk): pallas_call is not differentiable; wrap with jax.custom_vjp if
        # gradients w.r.t. student_output are needed for training.
        B, D = student_output.shape
        teacher_temp = float(self.teacher_temp_schedule[int(epoch)])
        if tile_b is None:
            tile_b = _choose_tile_b(B, D, student_output.dtype.itemsize)
        scalars = jnp.array(
            [1.0 / self.student_temp, 1.0 / teacher_temp, self.center_momentum],
            dtype=jnp.float32)
        loss, new_center = _dino_forward(student_output, teacher_output,
                                         self.center, scalars, tile_b=int(tile_b))
        # stateful buffer update (PyTorch register_buffer 'center')
        self.center = new_center
        return loss

    __call__ = forward


def _reference(student, teacher, center, student_temp, teacher_temp, momentum):
    s = np.asarray(student, np.float64) / student_temp
    t = (np.asarray(teacher, np.float64) - np.asarray(center, np.float64)) / teacher_temp
    t = t - t.max(-1, keepdims=True)
    t_soft = np.exp(t) / np.exp(t).sum(-1, keepdims=True)
    s = s - s.max(-1, keepdims=True)
    s_log = s - np.log(np.exp(s).sum(-1, keepdims=True))
    loss = np.mean(np.sum(-t_soft * s_log, axis=-1))
    batch_center = np.asarray(teacher, np.float64).mean(0, keepdims=True)
    new_center = np.asarray(center, np.float64) * momentum + batch_center * (1.0 - momentum)
    return loss, new_center


if __name__ == "__main__":
    key = jax.random.PRNGKey(0)
    k1, k2, k3, k4 = jax.random.split(key, 4)

    # --- test 1: small single-tile path -------------------------------------
    out_dim, batch, epoch = 128, 8, 3
    mod = DINOLossPallas(out_dim=out_dim, ncrops=2, warmup_teacher_temp=1.7,
                         teacher_temp=0.23, warmup_teacher_temp_epochs=50,
                         nepochs=100, student_temp=0.1, center_momentum=0.9)
    student = jax.random.normal(k1, (batch, out_dim), dtype=jnp.float32)
    teacher = jax.random.normal(k2, (batch, out_dim), dtype=jnp.float32)

    center0 = np.asarray(mod.center)
    loss = jax.block_until_ready(mod.forward(student, teacher, epoch))
    new_center = jax.block_until_ready(mod.center)
    temp = float(mod.teacher_temp_schedule[epoch])
    ref_loss, ref_center = _reference(student, teacher, center0,
                                      mod.student_temp, temp, mod.center_momentum)
    assert np.allclose(float(loss), ref_loss, rtol=1e-4, atol=1e-4), (float(loss), ref_loss)
    assert np.allclose(np.asarray(new_center), ref_center, rtol=1e-5, atol=1e-5)

    # --- test 2: multi-tile grid + ragged batch (masked tail), parallel axis --
    out_dim2, batch2, epoch2 = 256, 20, 60
    mod2 = DINOLossPallas(out_dim=out_dim2, ncrops=2, warmup_teacher_temp=1.7,
                          teacher_temp=0.23, warmup_teacher_temp_epochs=50,
                          nepochs=100)
    student2 = jax.random.normal(k3, (batch2, out_dim2), dtype=jnp.float32)
    teacher2 = jax.random.normal(k4, (batch2, out_dim2), dtype=jnp.float32)
    center0_2 = np.asarray(mod2.center)
    loss2 = jax.block_until_ready(mod2.forward(student2, teacher2, epoch2, tile_b=8))
    new_center2 = jax.block_until_ready(mod2.center)
    temp2 = float(mod2.teacher_temp_schedule[epoch2])
    ref_loss2, ref_center2 = _reference(student2, teacher2, center0_2,
                                        mod2.student_temp, temp2, mod2.center_momentum)
    assert np.allclose(float(loss2), ref_loss2, rtol=1e-4, atol=1e-4), (float(loss2), ref_loss2)
    assert np.allclose(np.asarray(new_center2), ref_center2, rtol=1e-5, atol=1e-5)

    # --- test 3: bf16 inputs (half the HBM traffic; compute stays f32) -------
    mod3 = DINOLossPallas(out_dim=out_dim, ncrops=2, warmup_teacher_temp=1.7,
                          teacher_temp=0.23, warmup_teacher_temp_epochs=50,
                          nepochs=100)
    s_bf = student.astype(jnp.bfloat16)
    t_bf = teacher.astype(jnp.bfloat16)
    center0_3 = np.asarray(mod3.center)
    loss3 = jax.block_until_ready(mod3.forward(s_bf, t_bf, epoch))
    ref_loss3, _ = _reference(np.asarray(s_bf.astype(jnp.float32)),
                              np.asarray(t_bf.astype(jnp.float32)),
                              center0_3, mod3.student_temp, temp, mod3.center_momentum)
    assert np.allclose(float(loss3), ref_loss3, rtol=1e-3, atol=1e-3), (float(loss3), ref_loss3)

    print("KERNEL_OK")
</pallas_src>

<mosaic_0001>
module attributes {stable_mosaic.version = 11 : i64} {
  func.func @_dino_loss_kernel(%arg0: i32, %arg1: memref<3xf32, #tpu.memory_space<smem>>, %arg2: memref<8x128xf32, #tpu.memory_space<vmem>>, %arg3: memref<8x128xf32, #tpu.memory_space<vmem>>, %arg4: memref<1x128xf32, #tpu.memory_space<vmem>>, %arg5: memref<1x128xf32, #tpu.memory_space<vmem>>, %arg6: memref<1x128xf32, #tpu.memory_space<vmem>>) attributes {dimension_semantics = [#tpu.dimension_semantics<parallel>], iteration_bounds = array<i64: 1>, scalar_prefetch = 0 : i64, scratch_operands = 0 : i64, tpu.core_type = #tpu.core_type<tc>, window_params = [{transform_indices = @transform_0, window_bounds = array<i64: 3>}, {transform_indices = @transform_1, window_bounds = array<i64: 8, 128>}, {transform_indices = @transform_2, window_bounds = array<i64: 8, 128>}, {pipeline_mode = #tpu.pipeline_mode<synchronous>, transform_indices = @transform_3, window_bounds = array<i64: 1, 128>}, {transform_indices = @transform_4, window_bounds = array<i64: 1, 128>}, {transform_indices = @transform_5, window_bounds = array<i64: 1, 128>}]} {
    %c0 = arith.constant 0 : index
    %0 = memref.load %arg1[%c0] : memref<3xf32, #tpu.memory_space<smem>>
    %c1 = arith.constant 1 : index
    %1 = memref.load %arg1[%c1] : memref<3xf32, #tpu.memory_space<smem>>
    %c0_0 = arith.constant 0 : index
    %c0_1 = arith.constant 0 : index
    %2 = vector.load %arg2[%c0_0, %c0_1] : memref<8x128xf32, #tpu.memory_space<vmem>>, vector<8x128xf32>
    %c0_2 = arith.constant 0 : index
    %c0_3 = arith.constant 0 : index
    %3 = vector.load %arg3[%c0_2, %c0_3] : memref<8x128xf32, #tpu.memory_space<vmem>>, vector<8x128xf32>
    %cst = arith.constant dense<0.000000e+00> : vector<128xf32>
    %4 = vector.multi_reduction <add>, %3, %cst [0] : vector<8x128xf32> to vector<128xf32>
    %5 = vector.shape_cast %4 : vector<128xf32> to vector<1x128xf32>
    %c0_4 = arith.constant 0 : index
    %c0_5 = arith.constant 0 : index
    %6 = vector.load %arg6[%c0_4, %c0_5] : memref<1x128xf32, #tpu.memory_space<vmem>>, vector<1x128xf32>
    tpu.vector_store %arg6[%c0_4, %c0_5], %5 {strides = array<i32>} : memref<1x128xf32, #tpu.memory_space<vmem>>, vector<1x128xf32>,
    %7 = vector.broadcast %0 : f32 to vector<8x128xf32>
    %8 = arith.mulf %2, %7 : vector<8x128xf32>
    %c0_6 = arith.constant 0 : index
    %c0_7 = arith.constant 0 : index
    %9 = vector.load %arg4[%c0_6, %c0_7] : memref<1x128xf32, #tpu.memory_space<vmem>>, vector<1x128xf32>
    %10 = vector.broadcast %9 : vector<1x128xf32> to vector<8x128xf32>
    %11 = arith.subf %3, %10 : vector<8x128xf32>
    %12 = vector.broadcast %1 : f32 to vector<8x128xf32>
    %13 = arith.mulf %11, %12 : vector<8x128xf32>
    %cst_8 = arith.constant dense<0xFF800000> : vector<8xf32>
    %14 = vector.multi_reduction <maximumf>, %8, %cst_8 [1] : vector<8x128xf32> to vector<8xf32>
    %15 = vector.shape_cast %14 : vector<8xf32> to vector<8x1xf32>
    %16 = vector.broadcast %15 : vector<8x1xf32> to vector<8x128xf32>
    %17 = arith.subf %8, %16 : vector<8x128xf32>
    %18 = math.exp %17 : vector<8x128xf32>
    %cst_9 = arith.constant dense<0.000000e+00> : vector<8xf32>
    %19 = vector.multi_reduction <add>, %18, %cst_9 [1] : vector<8x128xf32> to vector<8xf32>
    %20 = vector.shape_cast %19 : vector<8xf32> to vector<8x1xf32>
    %21 = math.log %20 : vector<8x1xf32>
    %cst_10 = arith.constant dense<0xFF800000> : vector<8xf32>
    %22 = vector.multi_reduction <maximumf>, %13, %cst_10 [1] : vector<8x128xf32> to vector<8xf32>
    %23 = vector.shape_cast %22 : vector<8xf32> to vector<8x1xf32>
    %24 = vector.broadcast %23 : vector<8x1xf32> to vector<8x128xf32>
    %25 = arith.subf %13, %24 : vector<8x128xf32>
    %26 = math.exp %25 : vector<8x128xf32>
    %cst_11 = arith.constant dense<0.000000e+00> : vector<8xf32>
    %27 = vector.multi_reduction <add>, %26, %cst_11 [1] : vector<8x128xf32> to vector<8xf32>
    %28 = vector.shape_cast %27 : vector<8xf32> to vector<8x1xf32>
    %29 = arith.mulf %26, %17 : vector<8x128xf32>
    %cst_12 = arith.constant dense<0.000000e+00> : vector<8xf32>
    %30 = vector.multi_reduction <add>, %29, %cst_12 [1] : vector<8x128xf32> to vector<8xf32>
    %31 = vector.shape_cast %30 : vector<8xf32> to vector<8x1xf32>
    %32 = tpu.reciprocal %28 {approx = true} : vector<8x1xf32> -> vector<8x1xf32>
    %33 = arith.mulf %28, %32 : vector<8x1xf32>
    %cst_13 = arith.constant 2.000000e+00 : f32
    %34 = vector.broadcast %cst_13 : f32 to vector<8x1xf32>
    %35 = arith.subf %34, %33 : vector<8x1xf32>
    %36 = arith.mulf %32, %35 : vector<8x1xf32>
    %37 = arith.mulf %28, %21 : vector<8x1xf32>
    %38 = arith.subf %37, %31 : vector<8x1xf32>
    %39 = arith.mulf %38, %36 : vector<8x1xf32>
    %40 = vector.shape_cast %39 : vector<8x1xf32> to vector<1x8x1xf32>
    %cst_14 = arith.constant dense<0.000000e+00> : vector<1xf32>
    %41 = vector.multi_reduction <add>, %40, %cst_14 [1, 2] : vector<1x8x1xf32> to vector<1xf32>
    %42 = vector.shape_cast %41 : vector<1xf32> to vector<1x1x1xf32>
    %43 = vector.extract %42[0, 0, 0] : f32 from vector<1x1x1xf32>
    %44 = vector.broadcast %43 : f32 to vector<1x128xf32>
    %c0_15 = arith.constant 0 : index
    %c0_16 = arith.constant 0 : index
    %45 = vector.load %arg5[%c0_15, %c0_16] : memref<1x128xf32, #tpu.memory_space<vmem>>, vector<1x128xf32>
    tpu.vector_store %arg5[%c0_15, %c0_16], %44 {strides = array<i32>} : memref<1x128xf32, #tpu.memory_space<vmem>>, vector<1x128xf32>,
    return
  }
  func.func @transform_0(%arg0: i32) -> i32 {
    %c0_i32 = arith.constant 0 : i32
    %c0_i32_0 = arith.constant 0 : i32
    return %c0_i32 : i32
  }
  func.func @transform_1(%arg0: i32) -> (i32, i32) {
    %c0_i32 = arith.constant 0 : i32
    %c0_i32_0 = arith.constant 0 : i32
    return %arg0, %c0_i32 : i32, i32
  }
  func.func @transform_2(%arg0: i32) -> (i32, i32) {
    %c0_i32 = arith.constant 0 : i32
    %c0_i32_0 = arith.constant 0 : i32
    return %arg0, %c0_i32 : i32, i32
  }
  func.func @transform_3(%arg0: i32) -> (i32, i32) {
    %c0_i32 = arith.constant 0 : i32
    %c0_i32_0 = arith.constant 0 : i32
    %c0_i32_1 = arith.constant 0 : i32
    return %c0_i32, %c0_i32_0 : i32, i32
  }
  func.func @transform_4(%arg0: i32) -> (i32, i32) {
    %c0_i32 = arith.constant 0 : i32
    %c0_i32_0 = arith.constant 0 : i32
    return %arg0, %c0_i32 : i32, i32
  }
  func.func @transform_5(%arg0: i32) -> (i32, i32) {
    %c0_i32 = arith.constant 0 : i32
    %c0_i32_0 = arith.constant 0 : i32
    return %arg0, %c0_i32 : i32, i32
  }
}

</mosaic_0001>

<bundles_post_ra>
// kernel: _dino_forward.1
= control target key start
LH: loop header
LB: loop body
LE: loop exit
PB: predicated region body
PF: predicated region fallthrough
CT: control target
= control target key end

     0   :  { %11 = vsyncpa [#allocation4], 0  ;;  %s286_s0 = inlined_call_operand.vmem [shape: f32[3], index: 0, kind: input, shape index: {}]   ;;  %s287_s1 = inlined_call_operand.hbm [shape: f32[8,128], index: 1, kind: input, shape index: {}]   ;;  %s288_s2 = inlined_call_operand.hbm [shape: f32[8,128], index: 2, kind: input, shape index: {}]   ;;  %s289_s3 = inlined_call_operand.hbm [shape: f32[1,128], index: 3, kind: input, shape index: {}]   ;;  %s290_s4 = inlined_call_operand.vmem [shape: f32[1,128], index: 4, kind: output, shape index: {0}]   ;;  %s291_s5 = inlined_call_operand.vmem [shape: f32[1,128], index: 5, kind: output, shape index: {1}]  }
   0x1   :  { %12 = vsyncpa [#allocation3], 0 }
   0x2   :  { %13 = vsyncpa [#allocation7], 0  ;;  %s20_s20 = sshll.u32 %s286_s0, 4  ;;  %s234_s21 = smov [#allocation6]   ;;  %s21_s20 = int_to_ptr.vmem [resolvable:$true] %s20_s20 }
   0x3   :  { %s40_s22 = sshll.u32 %s234_s21, 4  ;;  %s41_s22 = int_to_ptr.vmem [resolvable:$true] %s40_s22 }
   0x4   :  { %s164_s23 = scalar_lea.vmem %s41_s22, 128  ;;  %p169_p1 = scmp.lt.s32.totalorder %s41_s22, %s41_s22 }
   0x5   :  { %p165_p0 = scmp.ne.s32.totalorder %s41_s22, %s164_s23  ;;  %p170_p2 = scmp.lt.s32.totalorder %s164_s23, %s164_s23 }
   0x7   :  { %p171_p3 = por %p170_p2, %p169_p1 }
   0x9   :  { %p172_p4 = pnand %p171_p3, %p165_p0 }
   0xb   :  { %175 = shalt.err (!%p172_p4)
}
   0xc   :  { %43 = dma.hbm_to_vmem [thread:$0]  %s288_s2, 128, %s41_s22, [#allocation7]  }
   0xd   :  { %s176_s26 = scalar_lea.vmem %s21_s20, 16  ;;  %p181_p6 = scmp.lt.s32.totalorder %s21_s20, %s21_s20 }
   0xe   :  { %p177_p5 = scmp.ne.s32.totalorder %s21_s20, %s176_s26  ;;  %p182_p7 = scmp.lt.s32.totalorder %s176_s26, %s176_s26 }
  0x10   :  { %p183_p8 = por %p182_p7, %p181_p6 }
  0x12   :  { %p184_p9 = pnand %p183_p8, %p177_p5 }
  0x14   :  { %187 = shalt.err (!%p184_p9)
}
  0x15   :  { %s235_s0 = smov [#allocation2]   ;;  %s236_s27 = smov [#allocation5]  }
  0x16   :  { %23 = dma.vmem_to_smem %s21_s20, 16, %s235_s0, [#allocation4]  }
  0x17   :  { %s30_s28 = sshll.u32 %s236_s27, 4  ;;  %s237_s29 = smov [#allocation8]   ;;  %s31_s28 = int_to_ptr.vmem [resolvable:$true] %s30_s28 }
  0x18   :  { %s50_s30 = sshll.u32 %s237_s29, 4  ;;  %s196_s6 = scalar_lea.vmem %s31_s28, 128  ;;  %s51_s30 = int_to_ptr.vmem [resolvable:$true] %s50_s30 }
  0x19   :  { %p197_p10 = scmp.ne.s32.totalorder %s31_s28, %s196_s6  ;;  %p201_p11 = scmp.lt.s32.totalorder %s31_s28, %s31_s28 }
  0x1a   :  { %p202_p12 = scmp.lt.s32.totalorder %s196_s6, %s196_s6 }
  0x1c   :  { %p203_p13 = por %p202_p12, %p201_p11 }
  0x1e   :  { %p204_p0 = pnand %p203_p13, %p197_p10 }
  0x20   :  { %207 = shalt.err (!%p204_p0)
}
  0x21   :  { %33 = dma.hbm_to_vmem [thread:$0]  %s287_s1, 128, %s31_s28, [#allocation3]  }
  0x22   :  { %s216_s8 = scalar_lea.vmem %s51_s30, 16  ;;  %s220_s9 = scalar_lea.vmem %s51_s30, 32 }
  0x23   :  { %p217_p1 = scmp.ne.s32.totalorder %s51_s30, %s216_s8  ;;  %p221_p2 = scmp.lt.s32.totalorder %s51_s30, %s51_s30 }
  0x24   :  { %p222_p3 = scmp.lt.s32.totalorder %s220_s9, %s216_s8 }
  0x26   :  { %p223_p4 = por %p222_p3, %p221_p2 }
  0x28   :  { %p224_p5 = pnand %p223_p4, %p217_p1 }
  0x2a   :  { %227 = shalt.err (!%p224_p5)
}
  0x2b   :  { %53 = dma.hbm_to_vmem [thread:$0]  %s289_s3, 16, %s51_s30, [#allocation7]  }
  0x2c   :  { %228 = dma.done.wait [#allocation4], 16  }
  0x2d   :  { %229 = vsyncadd [#allocation4], 4294967280 }
  0x2e   :  { %230 = dma.done.wait [#allocation3], 128  }
  0x2f   :  { %231 = vsyncadd [#allocation3], 4294967168 }
  0x30   :  { %232 = dma.done.wait [#allocation7], 144  }
  0x31   :  { %233 = vsyncadd [#allocation7], 4294967152 }
  0x32   :  { %66 = sfence }
  0x33   :  { %s67_s1 = sld [smem:[#allocation2]]  ;;  %v70_v0 = vld [vmem:[#allocation6] sm:$0xff]  ;;  %v141_v2 = vld [vmem:[#allocation8] ss:$0 sm:$0xff]  ;;  %v69_v4 = vld [vmem:[#allocation5] sm:$0xff]  ;;  %vm116_vm0 = vcmask 7168  }
  0x34   :  { %s140_s12 = sld [smem:[#allocation2 + $0x1]]  ;;  %v71_v1 = vrot.slane %v70_v0, 4  ;;  %v87_v6 = vsub.f32 %v70_v0, %v141_v2 }
  0x36   :  { %v72_v3 = vadd.f32 %v71_v1, %v70_v0 }
  0x38   :  { %v73_v5 = vrot.slane %v72_v3, 2 }
  0x39   :  { %v78_v7 = vstv %s67_s1 }
  0x3a   :  { %v79_v8 = vmul.f32 %v78_v7, %v69_v4  ;;  %v74_v9 = vadd.f32 %v73_v5, %v72_v3  ;;  %v88_v10 = vstv %s140_s12 }
  0x3b   :  { %v89_v12 = vmul.f32 %v88_v10, %v87_v6 }
  0x3c   :  { %90 = vmax.xlane.f32.xlu0 %v79_v8  ;;  %v75_v11 = vrot.slane %v74_v9, 1 }
  0x3e   :  { %v76_v13 = vadd.f32 %v75_v11, %v74_v9 }
  0x40   :  { %77 = vst [vmem:[%s291_s5] sm:$0x1] %v76_v13  ;;  %99 = vmax.xlane.f32.xlu0 %v89_v12 }
  0xc5   :  { %v91_v14 = vpop.xlane.xlu0 %90 }
  0xc6   :  { %v92_v15 = vsub.f32 %v79_v8, %v91_v14 }
  0xc8   :  { %v93_v16 = vmul.f32 1.442695, %v92_v15 }
  0xc9   :  { %v100_v17 = vpop.xlane.xlu0 %99 }
  0xca   :  { %v101_v18 = vsub.f32 %v89_v12, %v100_v17  ;;  %148 = vpow2.f32 %v93_v16 }
  0xcc   :  { %v102_v19 = vmul.f32 1.442695, %v101_v18 }
  0xce   :  { %150 = vpow2.f32 %v102_v19 }
  0xd7   :  { %v149_v20 = vpop.eup %148 }
  0xd8   :  { %95 = vadd.xlane.f32.xlu1 %v149_v20 }
  0xdb   :  { %v151_v21 = vpop.eup %150 }
  0xdc   :  { %104 = vadd.xlane.f32.xlu1 %v151_v21  ;;  %v106_v22 = vmul.f32 %v151_v21, %v92_v15 }
  0xde   :  { %107 = vadd.xlane.f32.xlu0 %v106_v22 }
 0x161   :  { %v96_v23 = vpop.xlane.xlu1 %95 }
 0x162   :  { %152 = vlog2.f32 %v96_v23 }
 0x165   :  { %v105_v24 = vpop.xlane.xlu1 %104 }
 0x166   :  { %154 = vrcp.f32 %v105_v24 }
 0x167   :  { %v108_v31 = vpop.xlane.xlu0 %107 }
 0x16f   :  { %v153_v25 = vpop.eup %152 }
 0x170   :  { %v98_v26 = vmul.f32 0.6931472, %v153_v25 }
 0x172   :  { %v113_v29 = vmul.f32 %v105_v24, %v98_v26 }
 0x173   :  { %v155_v27 = vpop.eup %154 }
 0x174   :  { %v110_v28 = vmul.f32 %v155_v27, %v105_v24  ;;  %v114_v32 = vsub.f32 %v113_v29, %v108_v31 }
 0x176   :  { %v111_v30 = vsub.f32 2.0, %v110_v28 }
 0x178   :  { %v112_v33 = vmul.f32 %v155_v27, %v111_v30 }
 0x17a   :  { %v115_v34 = vmul.f32 %v114_v32, %v112_v33 }
 0x17c   :  { %v117_v35 = vsel %vm116_vm0, %v115_v34, 0.0 }
 0x17d   :  { %118 = vadd.xlane.f32.xlu1 %v117_v35 }
 0x206   :  { %v119_v36 = vpop.xlane.xlu1 %118 }
 0x207   :  { %v120_v37 = vrot.slane %v119_v36, 4 }
 0x209   :  { %v121_v38 = vadd.f32 %v120_v37, %v119_v36 }
 0x20b   :  { %v122_v39 = vrot.slane %v121_v38, 2 }
 0x20d   :  { %v123_v40 = vadd.f32 %v122_v39, %v121_v38 }
 0x20f   :  { %v124_v41 = vrot.slane %v123_v40, 1 }
 0x211   :  { %v125_v42 = vadd.f32 %v124_v41, %v123_v40 }
 0x213   :  { %142 = vpush %v125_v42 }
 0x244   :  { %s143_s5 = spop %142 }
 0x245   :  { %v127_v43 = vstv %s143_s5 }
 0x246   :  { %128 = vst [vmem:[%s290_s4] sm:$0x1] %v127_v43 }
 0x247   :  { %137 = vsyncpa [#allocation3], 1 }
 0x248   :  { %138 = vsyncpa [#allocation7], 1 }
 0x249   :  { %139 = vsyncpa [#allocation4], 1 }

</bundles_post_ra>
